<compile_context>
chip_gen: v5e
topology: v5e:2x2
jax: 0.10.0
libtpu: 0.0.40
codegen_flags: <defaults>
</compile_context>

<pallas_src>
import functools

import jax
import jax.numpy as jnp
from jax.experimental import pallas as pl
from jax.experimental.pallas import tpu as pltpu


def _sca_kernel(x_ref, t1_ref, t2_ref, o_ref, *, compute_dtype):
    # x_ref: (TB, Cin*H*W), t1_ref: (Cin*H*W, Cmid*H*W),
    # t2_ref: (Cmid*H*W, Cout*H*W), o_ref: (TB, Cout*H*W).  All lane-dense.
    x = x_ref[...].astype(compute_dtype)
    hidden = jnp.dot(x, t1_ref[...], preferred_element_type=jnp.float32)
    hidden = jnp.maximum(hidden, 0.0)      # ReLU in f32 on the VPU (v5e-safe)
    out = jnp.dot(hidden.astype(compute_dtype), t2_ref[...],
                  preferred_element_type=jnp.float32)
    o_ref[...] = out.astype(o_ref.dtype)


def _conv_weight_to_dense(w_oihw, H, W):
    """Dense block-Toeplitz matrix T such that, for x_flat with rows indexed
    (cin, h', w') (i.e. a *plain reshape* of an NCHW image), x_flat @ T equals
    conv2d(x, w, padding='same') flattened with columns indexed (cout, h, w).
    The zero entries of T encode the 'same' zero padding, and the NCHW layout
    is folded into T's row/column ordering so the wrapper needs no activation
    transposes."""
    Cout, Cin, K, _ = w_oihw.shape
    P = (K - 1) // 2
    # kernel tap index needed to connect input row h' to output row h.
    dh = jnp.arange(H)[:, None] - jnp.arange(H)[None, :] + P   # (H', H)
    dw = jnp.arange(W)[:, None] - jnp.arange(W)[None, :] + P   # (W', W)
    vh = (dh >= 0) & (dh < K)
    vw = (dw >= 0) & (dw < K)
    dh_c = jnp.clip(dh, 0, K - 1)
    dw_c = jnp.clip(dw, 0, K - 1)
    w_kkio = jnp.transpose(w_oihw, (2, 3, 1, 0))               # (K, K, Cin, Cout)
    # t6[h', h, w', w, ci, co] = w[kh=h'-h+P, kw=w'-w+P, ci, co] (0 if OOB)
    t6 = w_kkio[dh_c][:, :, dw_c]                              # (H', H, W', W, Cin, Cout)
    mask = (vh[:, :, None, None] & vw[None, None, :, :])[..., None, None]
    t6 = jnp.where(mask, t6, jnp.zeros_like(t6))
    # reorder to [(ci, h', w'), (co, h, w)]  -> NCHW layout folded into T.
    t = jnp.transpose(t6, (4, 0, 2, 5, 1, 3))
    return t.reshape(Cin * H * W, Cout * H * W)


def _round_up(x, m):
    return -(-x // m) * m


def _choose_block_batch(N, target=256, min_rows_per_step=128):
    """Per-grid-step row count TB (the matmul M dimension), always a multiple
    of 8 sublanes.  Run a single grid step unless every step would get at
    least `min_rows_per_step` real rows; large N uses a full 256-row MXU
    tile (sweep {128, 256} if the bundle dump shows spills)."""
    if N < 2 * min_rows_per_step:
        return _round_up(max(N, 1), 8)          # single grid step
    if N < 2 * target:
        return _round_up(-(-N // 2), 8)         # two balanced steps (>=128 rows each)
    return target


def sca_forward(x, w1_oihw, w2_oihw, kernel_size, compute_dtype=jnp.bfloat16):
    """x: (b, t, c, h, w); w1/w2 in PyTorch OIHW layout (bias=False).
    Returns (b, t, c, h, w).  compute_dtype sets the MXU operand dtype;
    accumulation is always float32."""
    b, t, c, h, w = x.shape
    N = b * t
    K = kernel_size
    assert K % 2 == 1, "this 'same'-padding lowering assumes odd kernel size"
    Cmid = w1_oihw.shape[0]
    Cout = w2_oihw.shape[0]
    assert w1_oihw.shape == (Cmid, c, K, K)
    assert w2_oihw.shape == (Cout, Cmid, K, K)
    assert Cout == c, "SCA reshapes back to (b, t, c, h, w); need Cout == c"

    HW = h * w
    chw_in, chw_mid, chw_out = c * HW, Cmid * HW, Cout * HW

    # Dense conv-as-matmul weights (tiny; built once in plain JAX).
    t1 = _conv_weight_to_dense(w1_oihw, h, w).astype(compute_dtype)
    t2 = _conv_weight_to_dense(w2_oihw, h, w).astype(compute_dtype)

    # Free reshape: the NCHW layout permutation lives inside T1/T2.
    x_flat = x.reshape(N, chw_in)
    TB = _choose_block_batch(N)
    N_pad = _round_up(N, TB)
    if N_pad != N:
        x_flat = jnp.pad(x_flat, ((0, N_pad - N), (0, 0)))
    G = N_pad // TB

    # Explicit VMEM budget (conservative: weights and I/O blocks counted at
    # Pallas' default double buffering, plus the in-kernel f32 intermediates).
    cd_bytes = jnp.dtype(compute_dtype).itemsize
    io_bytes = jnp.dtype(x.dtype).itemsize
    weight_vmem = 2 * (chw_in * chw_mid + chw_mid * chw_out) * cd_bytes
    block_vmem = 2 * TB * (chw_in + chw_out) * io_bytes
    scratch_vmem = TB * (chw_in * cd_bytes + chw_mid * (4 + cd_bytes) + chw_out * 4)
    vmem_budget = weight_vmem + block_vmem + scratch_vmem
    # v7x-aware design envelope (64 MiB physical VMEM per TensorCore).
    assert vmem_budget <= 48 * 1024 * 1024, (
        "spatial extent / tile too large for the dense-Toeplitz SCA kernel: "
        f"needs ~{vmem_budget >> 20} MiB of VMEM")
    vmem_limit = min(max(int(vmem_budget * 1.5) + (1 << 20), 16 * 1024 * 1024),
                     56 * 1024 * 1024)

    kernel = functools.partial(_sca_kernel, compute_dtype=compute_dtype)
    out_flat = pl.pallas_call(
        kernel,
        out_shape=jax.ShapeDtypeStruct((N_pad, chw_out), x.dtype),
        grid_spec=pltpu.PrefetchScalarGridSpec(
            num_scalar_prefetch=0,
            grid=(G,),
            in_specs=[
                pl.BlockSpec((TB, chw_in), lambda g: (g, 0)),
                # Constant index maps -> weights DMA'd once, resident in VMEM.
                pl.BlockSpec((chw_in, chw_mid), lambda g: (0, 0)),
                pl.BlockSpec((chw_mid, chw_out), lambda g: (0, 0)),
            ],
            out_specs=pl.BlockSpec((TB, chw_out), lambda g: (g, 0)),
        ),
        compiler_params=pltpu.CompilerParams(
            dimension_semantics=("parallel",),
            vmem_limit_bytes=vmem_limit),
    )(x_flat, t1, t2)

    if N_pad != N:
        out_flat = out_flat[:N]
    # Free reshape back: output columns are already ordered (c, h, w).
    return out_flat.reshape(b, t, Cout, h, w)


def sca_reference(x, w1_oihw, w2_oihw):
    """Pure-JAX reference mirroring the PyTorch module."""
    b, t, c, h, w = x.shape
    xf = x.reshape(b * t, c, h, w)
    dn = ("NCHW", "OIHW", "NCHW")
    y = jax.lax.conv_general_dilated(xf, w1_oihw, (1, 1), "SAME", dimension_numbers=dn)
    y = jnp.maximum(y, 0.0)
    y = jax.lax.conv_general_dilated(y, w2_oihw, (1, 1), "SAME", dimension_numbers=dn)
    return y.reshape(b, t, c, h, w)


if __name__ == "__main__":
    # Module config: SCA(in_planes=4, kerenel_size=3, ratio=1)
    b, t, c, h, w = 2, 2, 4, 8, 8
    K = 3
    ratio = 1
    c_mid = c // ratio

    key = jax.random.PRNGKey(0)
    kx, k1, k2 = jax.random.split(key, 3)
    x = jax.random.normal(kx, (b, t, c, h, w), dtype=jnp.float32)
    # Deterministic synthetic weights (Conv2d weight layout: OIHW, bias=False).
    w1 = jax.random.normal(k1, (c_mid, c, K, K), dtype=jnp.float32) * (1.0 / (c * K * K) ** 0.5)
    w2 = jax.random.normal(k2, (c, c_mid, K, K), dtype=jnp.float32) * (1.0 / (c_mid * K * K) ** 0.5)

    ref = sca_reference(x, w1, w2)

    # Default (performance) path: bf16 MXU operands, f32 accumulation.
    out_bf16 = jax.block_until_ready(sca_forward(x, w1, w2, kernel_size=K))
    assert out_bf16.shape == (b, t, c, h, w), out_bf16.shape
    assert jnp.allclose(out_bf16, ref, atol=5e-2, rtol=5e-2), \
        float(jnp.max(jnp.abs(out_bf16 - ref)))

    # Full-precision path: tight parity with the fp32 reference.
    out_f32 = jax.block_until_ready(
        sca_forward(x, w1, w2, kernel_size=K, compute_dtype=jnp.float32))
    assert jnp.allclose(out_f32, ref, atol=1e-4, rtol=1e-4), \
        float(jnp.max(jnp.abs(out_f32 - ref)))

    print("KERNEL_OK")
</pallas_src>

<mosaic_0001>
module attributes {stable_mosaic.version = 11 : i64} {
  func.func @_sca_kernel(%arg0: i32, %arg1: memref<8x256xf32, #tpu.memory_space<vmem>>, %arg2: memref<256x256xbf16, #tpu.memory_space<vmem>>, %arg3: memref<256x256xbf16, #tpu.memory_space<vmem>>, %arg4: memref<8x256xf32, #tpu.memory_space<vmem>>) attributes {dimension_semantics = [#tpu.dimension_semantics<parallel>], iteration_bounds = array<i64: 1>, scalar_prefetch = 0 : i64, scratch_operands = 0 : i64, tpu.core_type = #tpu.core_type<tc>, window_params = [{transform_indices = @transform_0, window_bounds = array<i64: 8, 256>}, {pipeline_mode = #tpu.pipeline_mode<synchronous>, transform_indices = @transform_1, window_bounds = array<i64: 256, 256>}, {pipeline_mode = #tpu.pipeline_mode<synchronous>, transform_indices = @transform_2, window_bounds = array<i64: 256, 256>}, {transform_indices = @transform_3, window_bounds = array<i64: 8, 256>}]} {
    %c0 = arith.constant 0 : index
    %c0_0 = arith.constant 0 : index
    %0 = vector.load %arg1[%c0, %c0_0] : memref<8x256xf32, #tpu.memory_space<vmem>>, vector<8x256xf32>
    %1 = arith.truncf %0 : vector<8x256xf32> to vector<8x256xbf16>
    %c0_1 = arith.constant 0 : index
    %c0_2 = arith.constant 0 : index
    %2 = vector.load %arg2[%c0_1, %c0_2] : memref<256x256xbf16, #tpu.memory_space<vmem>>, vector<256x256xbf16>
    %cst = arith.constant dense<0.000000e+00> : vector<8x256xf32>
    %3 = tpu.matmul %1, %2, %cst {dimension_numbers = #tpu.dot_dimension_numbers<[1], [0], [0], [1], [0, 0, 1, 1], [], []>} : vector<8x256xbf16>, vector<256x256xbf16>, vector<8x256xf32> -> vector<8x256xf32>
    %cst_3 = arith.constant 0.000000e+00 : f32
    %4 = vector.broadcast %cst_3 : f32 to vector<8x256xf32>
    %5 = arith.maximumf %3, %4 : vector<8x256xf32>
    %6 = arith.truncf %5 : vector<8x256xf32> to vector<8x256xbf16>
    %c0_4 = arith.constant 0 : index
    %c0_5 = arith.constant 0 : index
    %7 = vector.load %arg3[%c0_4, %c0_5] : memref<256x256xbf16, #tpu.memory_space<vmem>>, vector<256x256xbf16>
    %cst_6 = arith.constant dense<0.000000e+00> : vector<8x256xf32>
    %8 = tpu.matmul %6, %7, %cst_6 {dimension_numbers = #tpu.dot_dimension_numbers<[1], [0], [0], [1], [0, 0, 1, 1], [], []>} : vector<8x256xbf16>, vector<256x256xbf16>, vector<8x256xf32> -> vector<8x256xf32>
    %c0_7 = arith.constant 0 : index
    %c0_8 = arith.constant 0 : index
    %9 = vector.load %arg4[%c0_7, %c0_8] : memref<8x256xf32, #tpu.memory_space<vmem>>, vector<8x256xf32>
    tpu.vector_store %arg4[%c0_7, %c0_8], %8 {strides = array<i32>} : memref<8x256xf32, #tpu.memory_space<vmem>>, vector<8x256xf32>,
    return
  }
  func.func @transform_0(%arg0: i32) -> (i32, i32) {
    %c0_i32 = arith.constant 0 : i32
    %c0_i32_0 = arith.constant 0 : i32
    return %arg0, %c0_i32 : i32, i32
  }
  func.func @transform_1(%arg0: i32) -> (i32, i32) {
    %c0_i32 = arith.constant 0 : i32
    %c0_i32_0 = arith.constant 0 : i32
    %c0_i32_1 = arith.constant 0 : i32
    return %c0_i32, %c0_i32_0 : i32, i32
  }
  func.func @transform_2(%arg0: i32) -> (i32, i32) {
    %c0_i32 = arith.constant 0 : i32
    %c0_i32_0 = arith.constant 0 : i32
    %c0_i32_1 = arith.constant 0 : i32
    return %c0_i32, %c0_i32_0 : i32, i32
  }
  func.func @transform_3(%arg0: i32) -> (i32, i32) {
    %c0_i32 = arith.constant 0 : i32
    %c0_i32_0 = arith.constant 0 : i32
    return %arg0, %c0_i32 : i32, i32
  }
}

</mosaic_0001>

<bundles_post_ra>
// kernel: tpu_custom_call.1
= control target key start
LH: loop header
LB: loop body
LE: loop exit
PB: predicated region body
PF: predicated region fallthrough
CT: control target
= control target key end

     0   :  { %8 = vsyncpa [#allocation3], 0  ;;  %s1042_s0 = inlined_call_operand.hbm [shape: f32[8,256], index: 0, kind: input, shape index: {}]   ;;  %s1043_s1 = inlined_call_operand.hbm [shape: bf16[256,256], index: 1, kind: input, shape index: {}]   ;;  %s1044_s2 = inlined_call_operand.hbm [shape: bf16[256,256], index: 2, kind: input, shape index: {}]   ;;  %s1045_s3 = inlined_call_operand.hbm [shape: f32[8,256], index: 3, kind: output, shape index: {}]  }
   0x1   :  { %9 = vsyncpa [#allocation6], 0  ;;  %s26_s14 = sshll.u32 %s1043_s1, 4  ;;  %s27_s14 = int_to_ptr.hbm [resolvable:$true] %s26_s14 }
   0x2   :  { %10 = vsyncpa [#allocation4], 0  ;;  %s1004_s15 = smov [#allocation5]   ;;  %s16_s19 = sshll.u32 %s1042_s0, 4  ;;  %s17_s19 = int_to_ptr.hbm [resolvable:$true] %s16_s19 }
   0x3   :  { %s28_s16 = sshll.u32 %s1004_s15, 4  ;;  %s1005_s20 = smov 128   ;;  %s29_s16 = int_to_ptr.vmem [resolvable:$true] %s28_s16 }
   0x4   :  { %s1006_s21 = smov 8   ;;  %s1007_s22 = smov [#allocation2]  }
   0x5   :  { %34 = dma.hbm_to_vmem [thread:$0]  %s27_s14, 4096, %s29_s16, [#allocation6], %s1005_s20, %s1005_s20, %s1006_s21  }
   0x6   :  { %s18_s23 = sshll.u32 %s1007_s22, 4  ;;  %s39_s26 = sshll.u32 %s1044_s2, 4  ;;  %s19_s23 = int_to_ptr.vmem [resolvable:$true] %s18_s23  ;;  %s40_s26 = int_to_ptr.hbm [resolvable:$true] %s39_s26 }
   0x7   :  { %21 = dma.hbm_to_vmem [thread:$0]  %s17_s19, 256, %s19_s23, [#allocation3]  }
   0x8   :  { %s1008_s1 = smov [#allocation7]  }
   0x9   :  { %s41_s27 = sshll.u32 %s1008_s1, 4  ;;  %s42_s27 = int_to_ptr.vmem [resolvable:$true] %s41_s27 }
   0xa   :  { %47 = dma.hbm_to_vmem [thread:$0]  %s40_s26, 4096, %s42_s27, [#allocation6], %s1005_s20, %s1005_s20, %s1006_s21  }
   0xb   :  { %998 = dma.done.wait [#allocation3], 256  }
   0xc   :  { %999 = vsyncadd [#allocation3], 4294967040 }
   0xd   :  { %1000 = dma.done.wait [#allocation6], 8192  }
   0xe   :  { %1001 = vsyncadd [#allocation6], 4294959104  ;;  %v634_v0 = vld [vmem:[#allocation5 + $0x70] sm:$0xf]  ;;  %v847_v1 = vld [vmem:[#allocation5 + $0x74] sm:$0xf0] }
   0xf   :  { %v698_v2 = vld [vmem:[#allocation5 + $0xf0] sm:$0xf]  ;;  %v635_v3 = vor.u32 %v847_v1, %v634_v0  ;;  %v863_v4 = vld [vmem:[#allocation5 + $0xf4] sm:$0xf0]  ;;  %v846_v5 = vld [vmem:[#allocation5 + $0x74] sm:$0xf] }
  0x10   :  { %v636_v6 = vld [vmem:[#allocation5 + $0x78] sm:$0xf0]  ;;  %v699_v7 = vor.u32 %v863_v4, %v698_v2  ;;  %v862_v9 = vld [vmem:[#allocation5 + $0xf4] sm:$0xf]  ;;  %v626_v11 = vld [vmem:[#allocation5 + $0x60] sm:$0xf] }
  0x11   :  { %v639_v8 = vor.u32 %v846_v5, %v636_v6  ;;  %v700_v10 = vld [vmem:[#allocation5 + $0xf8] sm:$0xf0]  ;;  %256 = vmatpush.bf16.msra.mxu0 %v635_v3  ;;  %v845_v13 = vld [vmem:[#allocation5 + $0x64] sm:$0xf0]  ;;  %v690_v14 = vld [vmem:[#allocation5 + $0xe0] sm:$0xf] }
  0x12   :  { %v703_v12 = vor.u32 %v862_v9, %v700_v10  ;;  %v861_v15 = vld [vmem:[#allocation5 + $0xe4] sm:$0xf0]  ;;  %269 = vmatpush.bf16.msra.mxu1 %v699_v7  ;;  %v627_v16 = vor.u32 %v845_v13, %v626_v11  ;;  %v844_v18 = vld [vmem:[#allocation5 + $0x64] sm:$0xf]  ;;  %v628_v19 = vld [vmem:[#allocation5 + $0x68] sm:$0xf0] }
  0x13   :  { %282 = vmatpush.bf16.msra.mxu2 %v639_v8  ;;  %v691_v17 = vor.u32 %v861_v15, %v690_v14  ;;  %v860_v20 = vld [vmem:[#allocation5 + $0xe4] sm:$0xf]  ;;  %v631_v21 = vor.u32 %v844_v18, %v628_v19  ;;  %v692_v22 = vld [vmem:[#allocation5 + $0xe8] sm:$0xf0]  ;;  %v618_v23 = vld [vmem:[#allocation5 + $0x50] sm:$0xf] }
  0x14   :  { %295 = vmatpush.bf16.msra.mxu3 %v703_v12  ;;  %v843_v24 = vld [vmem:[#allocation5 + $0x54] sm:$0xf0]  ;;  %v695_v25 = vor.u32 %v860_v20, %v692_v22  ;;  %v682_v26 = vld [vmem:[#allocation5 + $0xd0] sm:$0xf]  ;;  %v842_v28 = vld [vmem:[#allocation5 + $0x54] sm:$0xf] }
  0x15   :  { %v859_v27 = vld [vmem:[#allocation5 + $0xd4] sm:$0xf0]  ;;  %257 = vmatpush.bf16.msra.mxu0 %v627_v16  ;;  %v619_v29 = vor.u32 %v843_v24, %v618_v23  ;;  %v620_v30 = vld [vmem:[#allocation5 + $0x58] sm:$0xf0]  ;;  %v858_v31 = vld [vmem:[#allocation5 + $0xd4] sm:$0xf] }
  0x16   :  { %v684_v32 = vld [vmem:[#allocation5 + $0xd8] sm:$0xf0]  ;;  %270 = vmatpush.bf16.msra.mxu1 %v691_v17  ;;  %v683_v33 = vor.u32 %v859_v27, %v682_v26  ;;  %v623_v34 = vor.u32 %v842_v28, %v620_v30  ;;  %v610_v35 = vld [vmem:[#allocation5 + $0x40] sm:$0xf]  ;;  %v841_v36 = vld [vmem:[#allocation5 + $0x44] sm:$0xf0] }
  0x17   :  { %283 = vmatpush.bf16.msra.mxu2 %v631_v21  ;;  %v674_v37 = vld [vmem:[#allocation5 + $0xc0] sm:$0xf]  ;;  %v687_v38 = vor.u32 %v858_v31, %v684_v32  ;;  %v857_v39 = vld [vmem:[#allocation5 + $0xc4] sm:$0xf0]  ;;  %v840_v40 = vld [vmem:[#allocation5 + $0x44] sm:$0xf]  ;;  %v611_v44 = vor.u32 %v841_v36, %v610_v35 }
  0x18   :  { %296 = vmatpush.bf16.msra.mxu3 %v695_v25  ;;  %v612_v41 = vld [vmem:[#allocation5 + $0x48] sm:$0xf0]  ;;  %v856_v42 = vld [vmem:[#allocation5 + $0xc4] sm:$0xf]  ;;  %v675_v45 = vor.u32 %v857_v39, %v674_v37  ;;  %v602_v47 = vld [vmem:[#allocation5 + $0x30] sm:$0xf] }
  0x19   :  { %v676_v43 = vld [vmem:[#allocation5 + $0xc8] sm:$0xf0]  ;;  %258 = vmatpush.bf16.msra.mxu0 %v619_v29  ;;  %v615_v46 = vor.u32 %v840_v40, %v612_v41  ;;  %v839_v48 = vld [vmem:[#allocation5 + $0x34] sm:$0xf0]  ;;  %v666_v49 = vld [vmem:[#allocation5 + $0xb0] sm:$0xf] }
  0x1a   :  { %271 = vmatpush.bf16.msra.mxu1 %v683_v33  ;;  %v679_v50 = vor.u32 %v856_v42, %v676_v43  ;;  %v855_v51 = vld [vmem:[#allocation5 + $0xb4] sm:$0xf0]  ;;  %v838_v52 = vld [vmem:[#allocation5 + $0x34] sm:$0xf]  ;;  %v604_v53 = vld [vmem:[#allocation5 + $0x38] sm:$0xf0]  ;;  %v603_v56 = vor.u32 %v839_v48, %v602_v47 }
  0x1b   :  { %284 = vmatpush.bf16.msra.mxu2 %v623_v34  ;;  %v854_v54 = vld [vmem:[#allocation5 + $0xb4] sm:$0xf]  ;;  %v668_v55 = vld [vmem:[#allocation5 + $0xb8] sm:$0xf0]  ;;  %v667_v57 = vor.u32 %v855_v51, %v666_v49  ;;  %v607_v58 = vor.u32 %v838_v52, %v604_v53  ;;  %v594_v59 = vld [vmem:[#allocation5 + $0x20] sm:$0xf] }
  0x1c   :  { %297 = vmatpush.bf16.msra.mxu3 %v687_v38  ;;  %v837_v60 = vld [vmem:[#allocation5 + $0x24] sm:$0xf0]  ;;  %v658_v61 = vld [vmem:[#allocation5 + $0xa0] sm:$0xf]  ;;  %v671_v62 = vor.u32 %v854_v54, %v668_v55  ;;  %v836_v0 = vld [vmem:[#allocation5 + $0x24] sm:$0xf] }
  0x1d   :  { %259 = vmatpush.bf16.msra.mxu0 %v611_v44  ;;  %v853_v63 = vld [vmem:[#allocation5 + $0xa4] sm:$0xf0]  ;;  %v596_v1 = vld [vmem:[#allocation5 + $0x28] sm:$0xf0]  ;;  %v852_v2 = vld [vmem:[#allocation5 + $0xa4] sm:$0xf]  ;;  %v595_v4 = vor.u32 %v837_v60, %v594_v59 }
  0x1e   :  { %272 = vmatpush.bf16.msra.mxu1 %v675_v45  ;;  %v660_v3 = vld [vmem:[#allocation5 + $0xa8] sm:$0xf0]  ;;  %v659_v5 = vor.u32 %v853_v63, %v658_v61  ;;  %v599_v6 = vor.u32 %v836_v0, %v596_v1  ;;  %v586_v7 = vld [vmem:[#allocation5 + $0x10] sm:$0xf]  ;;  %v835_v8 = vld [vmem:[#allocation5 + $0x14] sm:$0xf0] }
  0x1f   :  { %285 = vmatpush.bf16.msra.mxu2 %v615_v46  ;;  %v650_v9 = vld [vmem:[#allocation5 + $0x90] sm:$0xf]  ;;  %v663_v10 = vor.u32 %v852_v2, %v660_v3  ;;  %v851_v11 = vld [vmem:[#allocation5 + $0x94] sm:$0xf0]  ;;  %v834_v12 = vld [vmem:[#allocation5 + $0x14] sm:$0xf]  ;;  %v587_v16 = vor.u32 %v835_v8, %v586_v7 }
  0x20   :  { %298 = vmatpush.bf16.msra.mxu3 %v679_v50  ;;  %v588_v13 = vld [vmem:[#allocation5 + $0x18] sm:$0xf0]  ;;  %v850_v14 = vld [vmem:[#allocation5 + $0x94] sm:$0xf]  ;;  %v578_v17 = vld [vmem:[#allocation5] sm:$0xf]  ;;  %v651_v18 = vor.u32 %v851_v11, %v650_v9 }
  0x21   :  { %260 = vmatpush.bf16.msra.mxu0 %v603_v56  ;;  %v652_v15 = vld [vmem:[#allocation5 + $0x98] sm:$0xf0]  ;;  %v591_v19 = vor.u32 %v834_v12, %v588_v13  ;;  %v833_v20 = vld [vmem:[#allocation5 + $0x4] sm:$0xf0]  ;;  %v642_v21 = vld [vmem:[#allocation5 + $0x80] sm:$0xf] }
  0x22   :  { %273 = vmatpush.bf16.msra.mxu1 %v667_v57  ;;  %v849_v22 = vld [vmem:[#allocation5 + $0x84] sm:$0xf0]  ;;  %v655_v23 = vor.u32 %v850_v14, %v652_v15  ;;  %v832_v24 = vld [vmem:[#allocation5 + $0x4] sm:$0xf]  ;;  %v580_v25 = vld [vmem:[#allocation5 + $0x8] sm:$0xf0]  ;;  %v579_v30 = vor.u32 %v833_v20, %v578_v17 }
  0x23   :  { %286 = vmatpush.bf16.msra.mxu2 %v607_v58  ;;  %v848_v26 = vld [vmem:[#allocation5 + $0x84] sm:$0xf]  ;;  %v644_v27 = vld [vmem:[#allocation5 + $0x88] sm:$0xf0]  ;;  %v762_v28 = vld [vmem:[#allocation7 + $0x70] sm:$0xf]  ;;  %v643_v34 = vor.u32 %v849_v22, %v642_v21  ;;  %v583_v35 = vor.u32 %v832_v24, %v580_v25 }
  0x24   :  { %299 = vmatpush.bf16.msra.mxu3 %v671_v62  ;;  %v879_v29 = vld [vmem:[#allocation7 + $0x74] sm:$0xf0]  ;;  %v60_v31 = vld [vmem:[#allocation2] sm:$0xff]  ;;  %v764_v33 = vld [vmem:[#allocation7 + $0x78] sm:$0xf0]  ;;  %v647_v37 = vor.u32 %v848_v26, %v644_v27  ;;  %s1009_s0 = smov [#allocation8]  }
  0x25   :  { %261 = vmatpush.bf16.msra.mxu0 %v595_v4  ;;  %v878_v32 = vld [vmem:[#allocation7 + $0x74] sm:$0xf]  ;;  %v61_v36 = vld [vmem:[#allocation2 + $0x8] sm:$0xff]  ;;  %v763_v38 = vor.u32 %v879_v29, %v762_v28  ;;  %v754_v39 = vld [vmem:[#allocation7 + $0x60] sm:$0xf]  ;;  %v62_v42 = vpack.c.bf16 %v60_v31, %v60_v31  ;;  %s563_s2 = sshll.u32 %s1009_s0, 4  ;;  %s564_s2 = int_to_ptr.vmem [resolvable:$true] %s563_s2 }
  0x26   :  { %274 = vmatpush.bf16.msra.mxu1 %v659_v5  ;;  %v826_v40 = vld [vmem:[#allocation7 + $0xf0] sm:$0xf]  ;;  %v895_v41 = vld [vmem:[#allocation7 + $0xf4] sm:$0xf0]  ;;  %v767_v43 = vor.u32 %v878_v32, %v764_v33  ;;  %v877_v44 = vld [vmem:[#allocation7 + $0x64] sm:$0xf0]  ;;  %v63_v47 = vpack.c.bf16 %v61_v36, %v61_v36 }
  0x27   :  { %287 = vmatpush.bf16.msra.mxu2 %v599_v6  ;;  %v894_v45 = vld [vmem:[#allocation7 + $0xf4] sm:$0xf]  ;;  %v828_v46 = vld [vmem:[#allocation7 + $0xf8] sm:$0xf0]  ;;  %v876_v48 = vld [vmem:[#allocation7 + $0x64] sm:$0xf]  ;;  %v827_v50 = vor.u32 %v895_v41, %v826_v40  ;;  %v755_v51 = vor.u32 %v877_v44, %v754_v39 }
  0x28   :  { %300 = vmatpush.bf16.msra.mxu3 %v663_v10  ;;  %v756_v49 = vld [vmem:[#allocation7 + $0x68] sm:$0xf0]  ;;  %v831_v52 = vor.u32 %v894_v45, %v828_v46  ;;  %v746_v53 = vld [vmem:[#allocation7 + $0x50] sm:$0xf]  ;;  %v818_v54 = vld [vmem:[#allocation7 + $0xe0] sm:$0xf] }
  0x29   :  { %262 = vmatpush.bf16.msra.mxu0 %v587_v16  ;;  %v893_v55 = vld [vmem:[#allocation7 + $0xe4] sm:$0xf0]  ;;  %v759_v56 = vor.u32 %v876_v48, %v756_v49  ;;  %v875_v57 = vld [vmem:[#allocation7 + $0x54] sm:$0xf0]  ;;  %v892_v58 = vld [vmem:[#allocation7 + $0xe4] sm:$0xf] }
  0x2a   :  { %275 = vmatpush.bf16.msra.mxu1 %v651_v18  ;;  %v820_v59 = vld [vmem:[#allocation7 + $0xe8] sm:$0xf0]  ;;  %v874_v60 = vld [vmem:[#allocation7 + $0x54] sm:$0xf]  ;;  %v748_v61 = vld [vmem:[#allocation7 + $0x58] sm:$0xf0]  ;;  %v819_v62 = vor.u32 %v893_v55, %v818_v54  ;;  %v747_v63 = vor.u32 %v875_v57, %v746_v53 }
  0x2b   :  { %288 = vmatpush.bf16.msra.mxu2 %v591_v19  ;;  %v823_v0 = vor.u32 %v892_v58, %v820_v59  ;;  %v738_v1 = vld [vmem:[#allocation7 + $0x40] sm:$0xf]  ;;  %v810_v2 = vld [vmem:[#allocation7 + $0xd0] sm:$0xf]  ;;  %v891_v3 = vld [vmem:[#allocation7 + $0xd4] sm:$0xf0]  ;;  %v751_v4 = vor.u32 %v874_v60, %v748_v61 }
  0x2c   :  { %301 = vmatpush.bf16.msra.mxu3 %v655_v23  ;;  %v873_v5 = vld [vmem:[#allocation7 + $0x44] sm:$0xf0]  ;;  %v890_v6 = vld [vmem:[#allocation7 + $0xd4] sm:$0xf]  ;;  %v812_v7 = vld [vmem:[#allocation7 + $0xd8] sm:$0xf0]  ;;  %v811_v10 = vor.u32 %v891_v3, %v810_v2 }
  0x2d   :  { %263 = vmatpush.bf16.msra.mxu0 %v579_v30  ;;  %v872_v8 = vld [vmem:[#allocation7 + $0x44] sm:$0xf]  ;;  %v740_v9 = vld [vmem:[#allocation7 + $0x48] sm:$0xf0]  ;;  %v739_v11 = vor.u32 %v873_v5, %v738_v1  ;;  %v815_v12 = vor.u32 %v890_v6, %v812_v7  ;;  %v730_v13 = vld [vmem:[#allocation7 + $0x30] sm:$0xf] }
  0x2e   :  { %276 = vmatpush.bf16.msra.mxu1 %v643_v34  ;;  %v802_v14 = vld [vmem:[#allocation7 + $0xc0] sm:$0xf]  ;;  %v889_v15 = vld [vmem:[#allocation7 + $0xc4] sm:$0xf0]  ;;  %v743_v16 = vor.u32 %v872_v8, %v740_v9  ;;  %v871_v17 = vld [vmem:[#allocation7 + $0x34] sm:$0xf0] }
  0x2f   :  { %289 = vmatpush.bf16.msra.mxu2 %v583_v35  ;;  %v888_v18 = vld [vmem:[#allocation7 + $0xc4] sm:$0xf]  ;;  %v804_v19 = vld [vmem:[#allocation7 + $0xc8] sm:$0xf0]  ;;  %v870_v20 = vld [vmem:[#allocation7 + $0x34] sm:$0xf]  ;;  %v803_v22 = vor.u32 %v889_v15, %v802_v14  ;;  %v731_v23 = vor.u32 %v871_v17, %v730_v13 }
  0x30   :  { %302 = vmatpush.bf16.msra.mxu3 %v647_v37  ;;  %264 = vmatmul.bf16.vlgmr.msra.gmra.mxu0 %v62_v42  ;;  %v732_v21 = vld [vmem:[#allocation7 + $0x38] sm:$0xf0]  ;;  %v807_v24 = vor.u32 %v888_v18, %v804_v19  ;;  %v722_v25 = vld [vmem:[#allocation7 + $0x20] sm:$0xf]  ;;  %v794_v26 = vld [vmem:[#allocation7 + $0xb0] sm:$0xf] }
  0x31   :  { %504 = vmatpush.bf16.msrb.mxu0 %v763_v38  ;;  %277 = vmatmul.bf16.vlgmr.msra.gmra.mxu1 %v63_v47  ;;  %v887_v27 = vld [vmem:[#allocation7 + $0xb4] sm:$0xf0]  ;;  %v735_v28 = vor.u32 %v870_v20, %v732_v21  ;;  %v869_v29 = vld [vmem:[#allocation7 + $0x24] sm:$0xf0]  ;;  %v886_v30 = vld [vmem:[#allocation7 + $0xb4] sm:$0xf] }
  0x32   :  { %290 = vmatmul.bf16.vlgmr.msra.gmra.mxu2 %v62_v42  ;;  %517 = vmatpush.bf16.msrb.mxu1 %v827_v50  ;;  %v796_v31 = vld [vmem:[#allocation7 + $0xb8] sm:$0xf0]  ;;  %v868_v32 = vld [vmem:[#allocation7 + $0x24] sm:$0xf]  ;;  %v724_v33 = vld [vmem:[#allocation7 + $0x28] sm:$0xf0]  ;;  %v795_v34 = vor.u32 %v887_v27, %v794_v26  ;;  %v723_v35 = vor.u32 %v869_v29, %v722_v25 }
  0x33   :  { %530 = vmatpush.bf16.msrb.mxu2 %v767_v43  ;;  %303 = vmatmul.bf16.vlgmr.msra.gmra.mxu3 %v63_v47  ;;  %v799_v36 = vor.u32 %v886_v30, %v796_v31  ;;  %v727_v37 = vor.u32 %v868_v32, %v724_v33  ;;  %v714_v38 = vld [vmem:[#allocation7 + $0x10] sm:$0xf]  ;;  %v867_v39 = vld [vmem:[#allocation7 + $0x14] sm:$0xf0]  ;;  %v866_v40 = vld [vmem:[#allocation7 + $0x14] sm:$0xf] }
  0x34   :  { %543 = vmatpush.bf16.msrb.mxu3 %v831_v52  ;;  %v715_v41 = vor.u32 %v867_v39, %v714_v38  ;;  %v716_v42 = vld [vmem:[#allocation7 + $0x18] sm:$0xf0]  ;;  %v786_v44 = vld [vmem:[#allocation7 + $0xa0] sm:$0xf]  ;;  %v885_v45 = vld [vmem:[#allocation7 + $0xa4] sm:$0xf0] }
  0x35   :  { %505 = vmatpush.bf16.msrb.mxu0 %v755_v51  ;;  %v719_v43 = vor.u32 %v866_v40, %v716_v42  ;;  %v884_v46 = vld [vmem:[#allocation7 + $0xa4] sm:$0xf]  ;;  %v787_v47 = vor.u32 %v885_v45, %v786_v44  ;;  %v788_v48 = vld [vmem:[#allocation7 + $0xa8] sm:$0xf0]  ;;  %v706_v50 = vld [vmem:[#allocation7] sm:$0xf] }
  0x36   :  { %518 = vmatpush.bf16.msrb.mxu1 %v819_v62  ;;  %v791_v49 = vor.u32 %v884_v46, %v788_v48  ;;  %v865_v51 = vld [vmem:[#allocation7 + $0x4] sm:$0xf0]  ;;  %v864_v52 = vld [vmem:[#allocation7 + $0x4] sm:$0xf]  ;;  %v708_v54 = vld [vmem:[#allocation7 + $0x8] sm:$0xf0] }
  0x37   :  { %531 = vmatpush.bf16.msrb.mxu2 %v759_v56  ;;  %v707_v53 = vor.u32 %v865_v51, %v706_v50  ;;  %v711_v55 = vor.u32 %v864_v52, %v708_v54  ;;  %v778_v56 = vld [vmem:[#allocation7 + $0x90] sm:$0xf]  ;;  %v883_v57 = vld [vmem:[#allocation7 + $0x94] sm:$0xf0]  ;;  %v882_v58 = vld [vmem:[#allocation7 + $0x94] sm:$0xf] }
  0x38   :  { %544 = vmatpush.bf16.msrb.mxu3 %v823_v0  ;;  %v779_v59 = vor.u32 %v883_v57, %v778_v56  ;;  %v780_v60 = vld [vmem:[#allocation7 + $0x98] sm:$0xf0]  ;;  %v770_v62 = vld [vmem:[#allocation7 + $0x80] sm:$0xf]  ;;  %v880_v0 = vld [vmem:[#allocation7 + $0x84] sm:$0xf] }
  0x39   :  { %506 = vmatpush.bf16.msrb.mxu0 %v747_v63  ;;  %v783_v61 = vor.u32 %v882_v58, %v780_v60  ;;  %v881_v63 = vld [vmem:[#allocation7 + $0x84] sm:$0xf0]  ;;  %v772_v2 = vld [vmem:[#allocation7 + $0x88] sm:$0xf0]  ;;  %s565_s30 = sshll.u32 %s1045_s3, 4  ;;  %s566_s30 = int_to_ptr.hbm [resolvable:$true] %s565_s30 }
  0x3a   :  { %519 = vmatpush.bf16.msrb.mxu1 %v811_v10  ;;  %v771_v1 = vor.u32 %v881_v63, %v770_v62  ;;  %v775_v3 = vor.u32 %v880_v0, %v772_v2 }
  0x3b   :  { %532 = vmatpush.bf16.msrb.mxu2 %v751_v4 }
  0x3c   :  { %545 = vmatpush.bf16.msrb.mxu3 %v815_v12 }
  0x3d   :  { %507 = vmatpush.bf16.msrb.mxu0 %v739_v11 }
  0x3e   :  { %520 = vmatpush.bf16.msrb.mxu1 %v803_v22 }
  0x3f   :  { %533 = vmatpush.bf16.msrb.mxu2 %v743_v16 }
  0x40   :  { %546 = vmatpush.bf16.msrb.mxu3 %v807_v24 }
  0x41   :  { %508 = vmatpush.bf16.msrb.mxu0 %v731_v23 }
  0x42   :  { %521 = vmatpush.bf16.msrb.mxu1 %v795_v34 }
  0x43   :  { %534 = vmatpush.bf16.msrb.mxu2 %v735_v28 }
  0x44   :  { %547 = vmatpush.bf16.msrb.mxu3 %v799_v36 }
  0x45   :  { %509 = vmatpush.bf16.msrb.mxu0 %v723_v35 }
  0x46   :  { %522 = vmatpush.bf16.msrb.mxu1 %v787_v47 }
  0x47   :  { %535 = vmatpush.bf16.msrb.mxu2 %v727_v37 }
  0x48   :  { %548 = vmatpush.bf16.msrb.mxu3 %v791_v49 }
  0x49   :  { %510 = vmatpush.bf16.msrb.mxu0 %v715_v41 }
  0x4a   :  { %523 = vmatpush.bf16.msrb.mxu1 %v779_v59 }
  0x4b   :  { %536 = vmatpush.bf16.msrb.mxu2 %v719_v43 }
  0x4c   :  { %549 = vmatpush.bf16.msrb.mxu3 %v783_v61 }
  0x4d   :  { %511 = vmatpush.bf16.msrb.mxu0 %v707_v53 }
  0x4e   :  { %524 = vmatpush.bf16.msrb.mxu1 %v771_v1 }
  0x4f   :  { %537 = vmatpush.bf16.msrb.mxu2 %v711_v55 }
  0x50   :  { %550 = vmatpush.bf16.msrb.mxu3 %v775_v3 }
  0xad   :  { %v265_v4 = vpop.f32.mrf.mxu0 }
  0xae   :  { %v278_v5 = vpop.f32.mrf.mxu1 }
  0xaf   :  { %v279_v6 = vadd.f32 %v278_v5, %v265_v4 }
  0xb1   :  { %v308_v7 = vmax.f32 %v279_v6, 0.0 }
  0xb3   :  { %v310_v8 = vpack.c.bf16 %v308_v7, %v308_v7 }
  0xb5   :  { %v291_v9 = vpop.f32.mrf.mxu2  ;;  %512 = vmatmul.bf16.vlgmr.msrb.gmra.mxu0 %v310_v8  ;;  %538 = vmatmul.bf16.vlgmr.msrb.gmra.mxu2 %v310_v8  ;;  %v267_v11 = vpop.f32.mrf.mxu0 }
  0xb6   :  { %v304_v10 = vpop.f32.mrf.mxu3  ;;  %v280_v13 = vpop.f32.mrf.mxu1 }
  0xb7   :  { %v305_v12 = vadd.f32 %v304_v10, %v291_v9 }
  0xb9   :  { %v309_v14 = vmax.f32 %v305_v12, 0.0 }
  0xbb   :  { %v311_v15 = vpack.c.bf16 %v309_v14, %v309_v14 }
  0xbd   :  { %525 = vmatmul.bf16.vlgmr.msrb.gmra.mxu1 %v311_v15  ;;  %551 = vmatmul.bf16.vlgmr.msrb.gmra.mxu3 %v311_v15  ;;  %v293_v16 = vpop.f32.mrf.mxu2 }
  0xbe   :  { %v306_v17 = vpop.f32.mrf.mxu3 }
 0x132   :  { %v513_v18 = vpop.f32.mrf.mxu0 }
 0x138   :  { %v539_v19 = vpop.f32.mrf.mxu2 }
 0x13a   :  { %v526_v20 = vpop.f32.mrf.mxu1  ;;  %v515_v22 = vpop.f32.mrf.mxu0 }
 0x13b   :  { %v527_v21 = vadd.f32 %v526_v20, %v513_v18 }
 0x13d   :  { %556 = vst [vmem:[#allocation8] sm:$0xff] %v527_v21 }
 0x140   :  { %v552_v23 = vpop.f32.mrf.mxu3  ;;  %v541_v25 = vpop.f32.mrf.mxu2 }
 0x141   :  { %v553_v24 = vadd.f32 %v552_v23, %v539_v19 }
 0x142   :  { %v528_v26 = vpop.f32.mrf.mxu1 }
 0x143   :  { %557 = vst [vmem:[#allocation8 + $0x8] sm:$0xff] %v553_v24 }
 0x144   :  { %568 = dma.vmem_to_hbm [thread:$0]  %s564_s2, 256, %s566_s30, [#allocation4]  }
 0x148   :  { %v554_v27 = vpop.f32.mrf.mxu3 }
 0x149   :  { %1002 = dma.done.wait [#allocation4], 256  }
 0x14a   :  { %1003 = vsyncadd [#allocation4], 4294967040 }
 0x14b   :  { %573 = vsyncpa [#allocation3], 1 }
 0x14c   :  { %574 = vsyncpa [#allocation6], 1 }
 0x14d   :  { %575 = vsyncpa [#allocation4], 1 }

</bundles_post_ra>
